<compile_context>
chip_gen: v6e
topology: v6e:2x2x1
jax: 0.10.0
libtpu: 0.0.40
codegen_flags: <defaults>
</compile_context>

<pallas_src>
import functools

import jax
import jax.numpy as jnp
from jax.experimental import pallas as pl
from jax.experimental.pallas import tpu as pltpu


# TODO(synk): `NonLinear()` is not defined in the provided source; ReLU is used here.
def _self_attention_kernel(w0_ref, w1_ref, x_ref, o_ref, *, batch):
    # w0_ref, w1_ref: (F, F) f32  spectrally-normalized 1x1 conv weights
    # x_ref:          (B, F, L) f32
    # o_ref:          (B, F, L) f32
    w0 = w0_ref[...]                                              # (F, F)
    w1 = w1_ref[...]                                              # (F, F)

    # batch is tiny and static -> unrolled Python loop; each iteration is one
    # (F,F)@(F,L) channel-mix matmul per conv, all-f32, f32 accumulate.
    for b in range(batch):
        xb = x_ref[b]                                             # (F, L) f32
        # conv_0 (1x1, no bias)
        y = jnp.dot(w0, xb, preferred_element_type=jnp.float32)   # (F, L)
        # nlin_0 (NonLinear -> ReLU)
        y = jnp.maximum(y, 0.0)
        # conv_1 (1x1, no bias) — f32 straight into the MXU, no repack.
        z = jnp.dot(w1, y, preferred_element_type=jnp.float32)    # (F, L)

        # nlin_1: softmax over the spatial (L) axis, exact divide.
        m = jnp.max(z, axis=-1, keepdims=True)
        e = jnp.exp(z - m)
        s = jnp.sum(e, axis=-1, keepdims=True)
        o_ref[b] = (e / s).astype(o_ref.dtype)


def spectral_normalize(w, key, n_iter=30):
    """W / sigma_max(W) via deterministic power iteration (PyTorch SpectralNorm semantics)."""
    f_out, f_in = w.shape
    u = jax.random.normal(key, (f_out,), dtype=jnp.float32)
    u = u / (jnp.linalg.norm(u) + 1e-12)

    def body(_, u):
        v = w.T @ u
        v = v / (jnp.linalg.norm(v) + 1e-12)
        u = w @ v
        u = u / (jnp.linalg.norm(u) + 1e-12)
        return u

    u = jax.lax.fori_loop(0, n_iter, body, u)
    v = w.T @ u
    v = v / (jnp.linalg.norm(v) + 1e-12)
    sigma = u @ (w @ v)
    return w / sigma


@jax.jit
def self_attention_forward(x_nchw, w0_sn, w1_sn):
    """x_nchw: (B, F, H, W) float32. Returns (B, F, H, W) float32."""
    B, F, H, W = x_nchw.shape
    L = H * W

    # Only a contiguous reshape (free); no transpose, no dtype cast.
    x_bfl = x_nchw.reshape(B, F, L)

    out = pl.pallas_call(
        functools.partial(_self_attention_kernel, batch=B),
        out_shape=jax.ShapeDtypeStruct((B, F, L), jnp.float32),
        grid=(1,),  # everything fits VMEM: single step, zero revisit overhead
        in_specs=[
            pl.BlockSpec((F, F), lambda i: (0, 0)),        # w0 (full)
            pl.BlockSpec((F, F), lambda i: (0, 0)),        # w1 (full)
            pl.BlockSpec((B, F, L), lambda i: (0, 0, 0)),  # x (full)
        ],
        out_specs=pl.BlockSpec((B, F, L), lambda i: (0, 0, 0)),
        compiler_params=pltpu.CompilerParams(
            dimension_semantics=("arbitrary",),
        ),
    )(w0_sn, w1_sn, x_bfl)

    return out.reshape(B, F, H, W)


def reference_forward(x_nchw, w0_sn, w1_sn):
    """Pure-JAX f32 reference matching the PyTorch module semantics."""
    B, F, H, W = x_nchw.shape
    x = x_nchw.reshape(B, F, H * W)
    y = jnp.einsum("oi,bil->bol", w0_sn, x)
    y = jnp.maximum(y, 0.0)
    y = jnp.einsum("oi,bil->bol", w1_sn, y)
    y = jax.nn.softmax(y, axis=-1)
    return y.reshape(B, F, H, W)


if __name__ == "__main__":
    key = jax.random.PRNGKey(0)
    k_x, k_w0, k_w1, k_u0, k_u1 = jax.random.split(key, 5)

    B, F, H, W = 2, 8, 16, 16   # batch, features (channels), spatial
    x = jax.random.normal(k_x, (B, F, H, W), dtype=jnp.float32)

    # Conv1d(F, F, 1, bias=False) weights: (F, F, 1) -> matrix (F, F)
    w0 = jax.random.normal(k_w0, (F, F, 1), dtype=jnp.float32)[..., 0] * 0.3
    w1 = jax.random.normal(k_w1, (F, F, 1), dtype=jnp.float32)[..., 0] * 0.3

    w0_sn = spectral_normalize(w0, k_u0)
    w1_sn = spectral_normalize(w1, k_u1)

    out = self_attention_forward(x, w0_sn, w1_sn)
    out = jax.block_until_ready(out)

    ref = reference_forward(x, w0_sn, w1_sn)
    assert out.shape == (B, F, H, W)
    # Full-f32 path: tight tolerances (only accumulation-order differences).
    assert jnp.allclose(out, ref, atol=1e-5, rtol=1e-3), "mismatch vs reference"
    # Softmax rows must sum to ~1 (exact divide).
    row_sums = out.reshape(B, F, -1).sum(axis=-1)
    assert jnp.allclose(row_sums, 1.0, atol=1e-4), "softmax rows do not sum to 1"

    print("KERNEL_OK")
</pallas_src>

<mosaic_0001>
module attributes {stable_mosaic.version = 11 : i64} {
  func.func @_self_attention_kernel(%arg0: i32, %arg1: memref<8x8xf32, #tpu.memory_space<vmem>>, %arg2: memref<8x8xf32, #tpu.memory_space<vmem>>, %arg3: memref<2x8x256xf32, #tpu.memory_space<vmem>>, %arg4: memref<2x8x256xf32, #tpu.memory_space<vmem>>) attributes {dimension_semantics = [#tpu.dimension_semantics<arbitrary>], iteration_bounds = array<i64: 1>, scalar_prefetch = 0 : i64, scratch_operands = 0 : i64, tpu.core_type = #tpu.core_type<tc>, window_params = [{pipeline_mode = #tpu.pipeline_mode<synchronous>, transform_indices = @transform_0, window_bounds = array<i64: 8, 8>}, {pipeline_mode = #tpu.pipeline_mode<synchronous>, transform_indices = @transform_1, window_bounds = array<i64: 8, 8>}, {pipeline_mode = #tpu.pipeline_mode<synchronous>, transform_indices = @transform_2, window_bounds = array<i64: 2, 8, 256>}, {pipeline_mode = #tpu.pipeline_mode<synchronous>, transform_indices = @transform_3, window_bounds = array<i64: 2, 8, 256>}]} {
    %c0 = arith.constant 0 : index
    %c0_0 = arith.constant 0 : index
    %0 = vector.load %arg1[%c0, %c0_0] : memref<8x8xf32, #tpu.memory_space<vmem>>, vector<8x8xf32>
    %c0_1 = arith.constant 0 : index
    %c0_2 = arith.constant 0 : index
    %1 = vector.load %arg2[%c0_1, %c0_2] : memref<8x8xf32, #tpu.memory_space<vmem>>, vector<8x8xf32>
    %c0_3 = arith.constant 0 : index
    %c0_4 = arith.constant 0 : index
    %c0_5 = arith.constant 0 : index
    %2 = vector.load %arg3[%c0_3, %c0_4, %c0_5] : memref<2x8x256xf32, #tpu.memory_space<vmem>>, vector<1x8x256xf32>
    %3 = vector.shape_cast %2 : vector<1x8x256xf32> to vector<8x256xf32>
    %cst = arith.constant dense<0.000000e+00> : vector<8x256xf32>
    %4 = tpu.matmul %0, %3, %cst {dimension_numbers = #tpu.dot_dimension_numbers<[1], [0], [0], [1], [0, 0, 1, 1], [], []>} : vector<8x8xf32>, vector<8x256xf32>, vector<8x256xf32> -> vector<8x256xf32>
    %cst_6 = arith.constant 0.000000e+00 : f32
    %5 = vector.broadcast %cst_6 : f32 to vector<8x256xf32>
    %6 = arith.maximumf %4, %5 : vector<8x256xf32>
    %cst_7 = arith.constant dense<0.000000e+00> : vector<8x256xf32>
    %7 = tpu.matmul %1, %6, %cst_7 {dimension_numbers = #tpu.dot_dimension_numbers<[1], [0], [0], [1], [0, 0, 1, 1], [], []>} : vector<8x8xf32>, vector<8x256xf32>, vector<8x256xf32> -> vector<8x256xf32>
    %cst_8 = arith.constant dense<0xFF800000> : vector<8xf32>
    %8 = vector.multi_reduction <maximumf>, %7, %cst_8 [1] : vector<8x256xf32> to vector<8xf32>
    %9 = vector.shape_cast %8 : vector<8xf32> to vector<8x1xf32>
    %10 = vector.broadcast %9 : vector<8x1xf32> to vector<8x256xf32>
    %11 = arith.subf %7, %10 : vector<8x256xf32>
    %12 = math.exp %11 : vector<8x256xf32>
    %cst_9 = arith.constant dense<0.000000e+00> : vector<8xf32>
    %13 = vector.multi_reduction <add>, %12, %cst_9 [1] : vector<8x256xf32> to vector<8xf32>
    %14 = vector.shape_cast %13 : vector<8xf32> to vector<8x1xf32>
    %15 = vector.broadcast %14 : vector<8x1xf32> to vector<8x256xf32>
    %16 = arith.divf %12, %15 : vector<8x256xf32>
    %c0_10 = arith.constant 0 : index
    %c0_11 = arith.constant 0 : index
    %c0_12 = arith.constant 0 : index
    %17 = vector.load %arg4[%c0_10, %c0_11, %c0_12] : memref<2x8x256xf32, #tpu.memory_space<vmem>>, vector<1x8x256xf32>
    %18 = vector.shape_cast %17 : vector<1x8x256xf32> to vector<8x256xf32>
    %19 = vector.shape_cast %16 : vector<8x256xf32> to vector<1x8x256xf32>
    tpu.vector_store %arg4[%c0_10, %c0_11, %c0_12], %19 {strides = array<i32>} : memref<2x8x256xf32, #tpu.memory_space<vmem>>, vector<1x8x256xf32>,
    %c1 = arith.constant 1 : index
    %c0_13 = arith.constant 0 : index
    %c0_14 = arith.constant 0 : index
    %20 = vector.load %arg3[%c1, %c0_13, %c0_14] : memref<2x8x256xf32, #tpu.memory_space<vmem>>, vector<1x8x256xf32>
    %21 = vector.shape_cast %20 : vector<1x8x256xf32> to vector<8x256xf32>
    %cst_15 = arith.constant dense<0.000000e+00> : vector<8x256xf32>
    %22 = tpu.matmul %0, %21, %cst_15 {dimension_numbers = #tpu.dot_dimension_numbers<[1], [0], [0], [1], [0, 0, 1, 1], [], []>} : vector<8x8xf32>, vector<8x256xf32>, vector<8x256xf32> -> vector<8x256xf32>
    %cst_16 = arith.constant 0.000000e+00 : f32
    %23 = vector.broadcast %cst_16 : f32 to vector<8x256xf32>
    %24 = arith.maximumf %22, %23 : vector<8x256xf32>
    %cst_17 = arith.constant dense<0.000000e+00> : vector<8x256xf32>
    %25 = tpu.matmul %1, %24, %cst_17 {dimension_numbers = #tpu.dot_dimension_numbers<[1], [0], [0], [1], [0, 0, 1, 1], [], []>} : vector<8x8xf32>, vector<8x256xf32>, vector<8x256xf32> -> vector<8x256xf32>
    %cst_18 = arith.constant dense<0xFF800000> : vector<8xf32>
    %26 = vector.multi_reduction <maximumf>, %25, %cst_18 [1] : vector<8x256xf32> to vector<8xf32>
    %27 = vector.shape_cast %26 : vector<8xf32> to vector<8x1xf32>
    %28 = vector.broadcast %27 : vector<8x1xf32> to vector<8x256xf32>
    %29 = arith.subf %25, %28 : vector<8x256xf32>
    %30 = math.exp %29 : vector<8x256xf32>
    %cst_19 = arith.constant dense<0.000000e+00> : vector<8xf32>
    %31 = vector.multi_reduction <add>, %30, %cst_19 [1] : vector<8x256xf32> to vector<8xf32>
    %32 = vector.shape_cast %31 : vector<8xf32> to vector<8x1xf32>
    %33 = vector.broadcast %32 : vector<8x1xf32> to vector<8x256xf32>
    %34 = arith.divf %30, %33 : vector<8x256xf32>
    %c1_20 = arith.constant 1 : index
    %c0_21 = arith.constant 0 : index
    %c0_22 = arith.constant 0 : index
    %35 = vector.load %arg4[%c1_20, %c0_21, %c0_22] : memref<2x8x256xf32, #tpu.memory_space<vmem>>, vector<1x8x256xf32>
    %36 = vector.shape_cast %35 : vector<1x8x256xf32> to vector<8x256xf32>
    %37 = vector.shape_cast %34 : vector<8x256xf32> to vector<1x8x256xf32>
    tpu.vector_store %arg4[%c1_20, %c0_21, %c0_22], %37 {strides = array<i32>} : memref<2x8x256xf32, #tpu.memory_space<vmem>>, vector<1x8x256xf32>,
    return
  }
  func.func @transform_0(%arg0: i32) -> (i32, i32) {
    %c0_i32 = arith.constant 0 : i32
    %c0_i32_0 = arith.constant 0 : i32
    %c0_i32_1 = arith.constant 0 : i32
    return %c0_i32, %c0_i32_0 : i32, i32
  }
  func.func @transform_1(%arg0: i32) -> (i32, i32) {
    %c0_i32 = arith.constant 0 : i32
    %c0_i32_0 = arith.constant 0 : i32
    %c0_i32_1 = arith.constant 0 : i32
    return %c0_i32, %c0_i32_0 : i32, i32
  }
  func.func @transform_2(%arg0: i32) -> (i32, i32, i32) {
    %c0_i32 = arith.constant 0 : i32
    %c0_i32_0 = arith.constant 0 : i32
    %c0_i32_1 = arith.constant 0 : i32
    %c0_i32_2 = arith.constant 0 : i32
    return %c0_i32, %c0_i32_0, %c0_i32_1 : i32, i32, i32
  }
  func.func @transform_3(%arg0: i32) -> (i32, i32, i32) {
    %c0_i32 = arith.constant 0 : i32
    %c0_i32_0 = arith.constant 0 : i32
    %c0_i32_1 = arith.constant 0 : i32
    %c0_i32_2 = arith.constant 0 : i32
    return %c0_i32, %c0_i32_0, %c0_i32_1 : i32, i32, i32
  }
}

</mosaic_0001>

<bundles_post_ra>
// kernel: self_attention_forward.1
= control target key start
LH: loop header
LB: loop body
LE: loop exit
PB: predicated region body
PF: predicated region fallthrough
CT: control target
= control target key end

     0   :  { %v376_v2 = vmov 0.0   ;;  %vm18_vm0 = vcmask 64512   ;;  %s431_s2 = inlined_call_operand.vmem [shape: f32[2,8,256], index: 2, kind: input, shape index: {}]   ;;  %s432_s0 = inlined_call_operand.vmem [shape: f32[8,8], index: 0, kind: input, shape index: {}]   ;;  %s433_s1 = inlined_call_operand.vmem [shape: f32[8,8], index: 1, kind: input, shape index: {}]   ;;  %s434_s3 = inlined_call_operand.vmem [shape: f32[2,8,256], index: 3, kind: output, shape index: {}]  }
   0x1   :  { %v17_v0 = vld [vmem:[%s431_s2 + $0x8] sm:$0xff]  ;;  %v16_v1 = vld [vmem:[%s431_s2] sm:$0xff]  ;;  %86 = vmatprep.mubr.f32.mxu0 %v376_v2  ;;  %162 = vmatprep.mubr.f32.mxu1 %v376_v2  ;;  %v358_v4 = vld [vmem:[%s431_s2 + $0x18] sm:$0xff] }
   0x2   :  { %v14_v3 = vld [vmem:[%s432_s0] sm:$0xff]  ;;  %52 = vmatprep.subr.mxu0 %v17_v0  ;;  %v357_v5 = vld [vmem:[%s431_s2 + $0x10] sm:$0xff] }
   0x3   :  { %53 = vmatpush1.msra.mxu0 %v16_v1  ;;  %v15_v11 = vld [vmem:[%s433_s1] sm:$0xff] }
   0x4   :  { %355 = vmatmul.mubr.msk.f32.vlgmr.msra.gmra.mxu0 %vm18_vm0, %v14_v3  ;;  %219 = vmatprep.subr.mxu0 %v358_v4 }
   0x5   :  { %220 = vmatpush1.msra.mxu0 %v357_v5  ;;  %253 = vmatprep.mubr.f32.mxu0 %v376_v2 }
   0x8   :  { %359 = vmatmul.mubr.msk.f32.vlgmr.msra.gmra.mxu0 %vm18_vm0, %v14_v3 }
  0xc4   :  { %v88_v6 = vpop.f32.mrf.mxu0 }
  0xc5   :  { %v93_v9 = vmax.f32 %v88_v6, 0.0 }
  0xc6   :  { %v90_v7 = vpop.f32.mrf.mxu0 }
  0xc7   :  { %v94_v8 = vmax.f32 %v90_v7, 0.0 }
  0xc8   :  { %v255_v10 = vpop.f32.mrf.mxu0 }
  0xc9   :  { %128 = vmatprep.subr.mxu1 %v94_v8  ;;  %v260_v14 = vmax.f32 %v255_v10, 0.0 }
  0xca   :  { %129 = vmatpush1.msra.mxu1 %v93_v9  ;;  %v257_v12 = vpop.f32.mrf.mxu0 }
  0xcb   :  { %v261_v13 = vmax.f32 %v257_v12, 0.0  ;;  %356 = vmatmul.mubr.msk.f32.vlgmr.msra.gmra.mxu1 %vm18_vm0, %v15_v11 }
  0xcc   :  { %326 = vmatprep.mubr.f32.mxu1 %v376_v2 }
  0xcd   :  { %292 = vmatprep.subr.mxu1 %v261_v13 }
  0xce   :  { %293 = vmatpush1.msra.mxu1 %v260_v14 }
  0xcf   :  { %360 = vmatmul.mubr.msk.f32.vlgmr.msra.gmra.mxu1 %vm18_vm0, %v15_v11 }
 0x18b   :  { %v164_v15 = vpop.f32.mrf.mxu1 }
 0x18d   :  { %v166_v16 = vpop.f32.mrf.mxu1 }
 0x18e   :  { %v169_v17 = vmax.f32 %v164_v15, %v166_v16 }
 0x18f   :  { %v328_v18 = vpop.f32.mrf.mxu1 }
 0x190   :  { %170 = vmax.xlane.f32.xlu0 %v169_v17 }
 0x191   :  { %v330_v19 = vpop.f32.mrf.mxu1 }
 0x192   :  { %v333_v20 = vmax.f32 %v328_v18, %v330_v19 }
 0x194   :  { %334 = vmax.xlane.f32.xlu0 %v333_v20 }
 0x219   :  { %v171_v21 = vpop.xlane.xlu0 %170 }
 0x21a   :  { %v172_v22 = vsub.f32 %v164_v15, %v171_v21  ;;  %v173_v23 = vsub.f32 %v166_v16, %v171_v21 }
 0x21c   :  { %v174_v24 = vmul.f32 1.442695, %v172_v22  ;;  %v176_v25 = vmul.f32 1.442695, %v173_v23 }
 0x21d   :  { %v335_v26 = vpop.xlane.xlu0 %334 }
 0x21e   :  { %364 = vpow2.f32 %v174_v24  ;;  %v336_v27 = vsub.f32 %v328_v18, %v335_v26  ;;  %v337_v28 = vsub.f32 %v330_v19, %v335_v26 }
 0x21f   :  { %366 = vpow2.f32 %v176_v25 }
 0x220   :  { %v338_v29 = vmul.f32 1.442695, %v336_v27  ;;  %v340_v30 = vmul.f32 1.442695, %v337_v28 }
 0x222   :  { %368 = vpow2.f32 %v338_v29 }
 0x223   :  { %370 = vpow2.f32 %v340_v30 }
 0x22b   :  { %v365_v31 = vpop.eup %364 }
 0x22c   :  { %v367_v32 = vpop.eup %366 }
 0x22d   :  { %v178_v33 = vadd.f32 %v367_v32, %v365_v31 }
 0x22f   :  { %v369_v34 = vpop.eup %368  ;;  %179 = vadd.xlane.f32.xlu1 %v178_v33 }
 0x230   :  { %v371_v35 = vpop.eup %370 }
 0x231   :  { %v342_v36 = vadd.f32 %v371_v35, %v369_v34 }
 0x233   :  { %343 = vadd.xlane.f32.xlu1 %v342_v36 }
 0x2b8   :  { %v180_v37 = vpop.xlane.xlu1 %179 }
 0x2b9   :  { %372 = vrcp.f32 %v180_v37 }
 0x2bc   :  { %v344_v38 = vpop.xlane.xlu1 %343 }
 0x2bd   :  { %374 = vrcp.f32 %v344_v38 }
 0x2c6   :  { %v373_v39 = vpop.eup %372 }
 0x2c7   :  { %v182_v40 = vmul.f32 %v373_v39, %v365_v31  ;;  %v183_v41 = vmul.f32 %v373_v39, %v367_v32 }
 0x2c9   :  { %184 = vst [vmem:[%s434_s3] sm:$0xff] %v182_v40  ;;  %185 = vst [vmem:[%s434_s3 + $0x8] sm:$0xff] %v183_v41 }
 0x2ca   :  { %v375_v42 = vpop.eup %374 }
 0x2cb   :  { %v346_v43 = vmul.f32 %v375_v42, %v369_v34  ;;  %v347_v44 = vmul.f32 %v375_v42, %v371_v35 }
 0x2cd   :  { %361 = vst [vmem:[%s434_s3 + $0x10] sm:$0xff] %v346_v43  ;;  %362 = vst [vmem:[%s434_s3 + $0x18] sm:$0xff] %v347_v44 }

</bundles_post_ra>
